<compile_context>
chip_gen: v6e
topology: v6e:2x2x1
jax: 0.10.0
libtpu: 0.0.40
codegen_flags: <defaults>
</compile_context>

<pallas_src>
import numpy as np
import jax
import jax.numpy as jnp
from jax.experimental import pallas as pl
from jax.experimental.pallas import tpu as pltpu


# --------------------------------------------------------------------------- #
# Small helpers: hardware rolls on tile-aligned shapes, safe fallback otherwise
# --------------------------------------------------------------------------- #
def _shift_lanes(x, shift):
    """Circular lane shift.  XLU rotate on vreg-aligned tiles (production path:
    [8, k*128] row tiles); slice+concat fallback for sub-tile shapes."""
    if shift == 0:
        return x
    if x.shape[-1] % 128 == 0 and x.shape[0] % 8 == 0:
        return pltpu.roll(x, shift=shift, axis=1)
    return jnp.roll(x, shift, axis=1)


def _shift_rows(x, shift):
    """Circular row (sublane) shift for the overlap-add; XLU rotate when the row
    count is sublane-aligned, slice+concat fallback otherwise."""
    if shift == 0:
        return x
    if x.shape[0] % 8 == 0:
        return pltpu.roll(x, shift=shift, axis=0)
    return jnp.roll(x, shift, axis=0)


# --------------------------------------------------------------------------- #
# Kernel
# --------------------------------------------------------------------------- #
def _filtered_noise_kernel(h_ref, noise_ref, mask_ref, wpad_ref, o_ref, buf_ref):
    # h_ref    : [M, NB]   real half-spectra (M = Bb * t frame rows)
    # noise_ref: [M, Fr]   uniform noise in [-1, 1)
    # mask_ref : [M, NK]   0/1 overlap-add validity masks (batch boundaries)
    # wpad_ref : [NB, WP]  cosine basis (irfft+roll+hann) pre-placed at the OLA
    #                      lane offset inside a zero slab, WP = ceil(NK*Fr/128)*128
    # o_ref    : [M, Fr]   output frames
    # buf_ref  : [M, WP]   VMEM scratch, holds firwin slab then the conv result
    MB = o_ref.shape[0]
    Fr = noise_ref.shape[1]
    NK = mask_ref.shape[1]
    K1 = (NK - 1) // 2

    # ---- 1) Time-varying FIR design: one MXU matmul for the whole block. ----
    buf_ref[...] = jnp.dot(h_ref[...], wpad_ref[...],
                           preferred_element_type=jnp.float32)

    # ---- 2) Fused per-row full convolution (replaces G scratch + G@S). ------
    # Per row-tile: load firwin slab + noise, accumulate the shifted outer
    # products in registers (value accumulator, ~8 live vregs), store once.
    def conv_tile(fw, nz):
        acc = nz[:, 0:1] * fw                       # j = 0, no shift
        for j in range(1, Fr):
            acc = acc + nz[:, j:j + 1] * _shift_lanes(fw, j)
        return acc

    R = 8                                           # row tile (review rec: 8-16)
    if MB % R == 0:
        def tile_body(i, carry):
            r0 = pl.multiple_of(i * R, R)
            fw = buf_ref[pl.ds(r0, R), :]
            nz = noise_ref[pl.ds(r0, R), :]
            buf_ref[pl.ds(r0, R), :] = conv_tile(fw, nz)   # overwrite in place
            return carry
        jax.lax.fori_loop(0, MB // R, tile_body, 0)
    else:
        # Tiny blocks only (e.g. the unit test, M = 12): whole block at once.
        buf_ref[...] = conv_tile(buf_ref[...], noise_ref[...])

    # ---- 3) Overlap-add: value-accumulated row rolls + masks, single store. --
    # Column block k of the conv slab belongs to output frame (row + k - K1) of
    # the same batch element; masked circular row rolls fold it in.
    out = buf_ref[:, K1 * Fr:(K1 + 1) * Fr]          # k == K1: shift 0, always valid
    for k in range(NK):
        if k == K1:
            continue
        blk = buf_ref[:, k * Fr:(k + 1) * Fr]
        out = out + mask_ref[:, k:k + 1] * _shift_rows(blk, (k - K1) % MB)
    # TODO(synk): output lane width is framesize (< 128 in default configs), so this
    # final store is a masked partial vst; packing t frames per output row (rec 9)
    # would need an in-kernel [Bb*t, Fr] -> [Bb, t*Fr] relayout and is left out.
    o_ref[...] = out.astype(o_ref.dtype)


# --------------------------------------------------------------------------- #
# Static design matrices / masks / sizing
# --------------------------------------------------------------------------- #
def _design_matrices(NB, Fr):
    """Wpad folds irfft + roll + hann and already places the length-L filter at
    its overlap-add lane offset inside a lane-aligned zero slab."""
    L = 2 * NB - 1
    K1 = -(-(NB - 1) // Fr)                      # ceil((NB-1)/Fr)
    NK = 2 * K1 + 1
    width = NK * Fr
    WP = -(-width // 128) * 128                  # lane-align (vreg-aligned rolls)
    offset = K1 * Fr - (NB - 1)

    # W[c, n] = hann[n] * irfft_cos[c, (n - (NB-1)) mod L]
    # irfft of a real half-spectrum (odd L): (1/L)*(H[0] + 2*sum_c H[c]*cos(2*pi*c*n/L))
    c = np.arange(NB, dtype=np.float64)[:, None]
    n_src = np.mod(np.arange(L) - (NB - 1), L).astype(np.float64)[None, :]
    scale = np.where(np.arange(NB)[:, None] == 0, 1.0, 2.0) / L
    cos_mat = scale * np.cos(2.0 * np.pi * c * n_src / L)
    hann = 0.5 - 0.5 * np.cos(2.0 * np.pi * np.arange(L) / L)   # periodic (torch default)
    W = cos_mat * hann[None, :]

    Wpad = np.zeros((NB, WP), np.float32)
    Wpad[:, offset:offset + L] = W
    return Wpad, K1, NK, WP


def _ola_masks(B, T, K1, NK):
    """masks[b*T + t', k] = 1 iff frame (t' + K1 - k) exists in the same batch element."""
    t_idx = np.arange(B * T) % T
    shift = K1 - np.arange(NK)
    tv = t_idx[:, None] + shift[None, :]
    return ((tv >= 0) & (tv < T)).astype(np.float32)            # [B*T, NK]


def _tpu_vmem_capacity_bytes():
    """Physical per-core VMEM (generation aware); conservative v7x-sized fallback."""
    try:
        return int(pltpu.get_tpu_info().vmem_capacity_bytes)
    except Exception:
        return 64 * 1024 * 1024


def _vmem_limit_bytes():
    # The fused kernel needs only a few MiB per grid step; cap well under the
    # physical VMEM (64 MiB on v7x, 128 MiB on v5e/v6e) instead of a hard 48 MiB.
    return min(_tpu_vmem_capacity_bytes() // 2, 32 * 1024 * 1024)


def _pick_batch_block(B, T):
    """Rows per grid step: keep >=2 grid steps whenever a (Bb*t)%8==0 block exists
    (megacore / v7x dual-TensorCore sharding + DMA/compute overlap), and size the
    block by VMEM generation (~512 rows on 128 MiB chips, ~256 on v7x's 64 MiB)."""
    target_rows = 512 if _tpu_vmem_capacity_bytes() >= 96 * 1024 * 1024 else 256
    cands = [bb for bb in range(1, B) if B % bb == 0 and (bb * T) % 8 == 0]
    if not cands:
        return B        # single-step grid; block == full array, 8-row rule waived
    under = [bb for bb in cands if bb * T <= target_rows]
    return max(under) if under else min(cands)


# --------------------------------------------------------------------------- #
# Wrapper
# --------------------------------------------------------------------------- #
def filtered_noise_generator(H, noise):
    """H: [B, t, nbands] f32 (real half-spectra); noise: [B, t, framesize] f32 in [-1, 1).
    Returns [B, t*framesize] f32, matching FilteredNoiseGenerator.forward."""
    B, T, NB = H.shape
    Fr = noise.shape[2]

    Wpad, K1, NK, WP = _design_matrices(NB, Fr)
    masks = _ola_masks(B, T, K1, NK)

    Bb = _pick_batch_block(B, T)
    MBb = Bb * T

    # Plain XLA reshapes outside the kernel (free); the kernel only touches dense
    # 2-D [rows, lanes] tiles.
    H2 = H.reshape(B * T, NB).astype(jnp.float32)
    noise2 = noise.reshape(B * T, Fr).astype(jnp.float32)

    out2 = pl.pallas_call(
        _filtered_noise_kernel,
        out_shape=jax.ShapeDtypeStruct((B * T, Fr), jnp.float32),
        grid_spec=pltpu.PrefetchScalarGridSpec(
            num_scalar_prefetch=0,
            grid=(B // Bb,),
            in_specs=[
                pl.BlockSpec((MBb, NB), lambda b: (b, 0)),    # H (frames)
                pl.BlockSpec((MBb, Fr), lambda b: (b, 0)),    # noise (frames)
                pl.BlockSpec((MBb, NK), lambda b: (b, 0)),    # OLA masks
                pl.BlockSpec((NB, WP), lambda b: (0, 0)),     # Wpad (grid constant, ~100 KiB)
            ],
            out_specs=pl.BlockSpec((MBb, Fr), lambda b: (b, 0)),
            scratch_shapes=[pltpu.VMEM((MBb, WP), jnp.float32)],
        ),
        compiler_params=pltpu.CompilerParams(
            dimension_semantics=("parallel",),
            vmem_limit_bytes=_vmem_limit_bytes(),
        ),
    )(H2, noise2, jnp.asarray(masks), jnp.asarray(Wpad))

    # [B*t, framesize] -> [B, t*framesize]
    return out2.reshape(B, T * Fr)


# --------------------------------------------------------------------------- #
# Reference + test
# --------------------------------------------------------------------------- #
def _reference(H, noise):
    """Pure numpy re-implementation of the PyTorch forward (same noise tensor)."""
    H = np.asarray(H, np.float64)
    noise = np.asarray(noise, np.float64)
    B, T, NB = H.shape
    Fr = noise.shape[2]
    N = 2 * NB - 1
    zero_phase = np.fft.irfft(H, n=N, axis=-1)
    lin_phase = np.roll(zero_phase, NB - 1, axis=-1)
    hann = 0.5 - 0.5 * np.cos(2.0 * np.pi * np.arange(N) / N)   # torch.hann_window (periodic)
    firwin = lin_phase * hann
    Lout = Fr + N - 1
    total = T * Fr + N - 1
    out = np.zeros((B, total))
    for b in range(B):
        for tt in range(T):
            out[b, tt * Fr: tt * Fr + Lout] += np.convolve(noise[b, tt], firwin[b, tt])
    return out[:, NB - 1: -(NB - 1)].astype(np.float32)


if __name__ == "__main__":
    # Small test sizes (nbands chosen so the OLA spans +/-2 frames, exercising the
    # general shifted-add path): batch=2, frames=6, nbands=13, framesize=8.
    B, T, NB, Fr = 2, 6, 13, 8
    key = jax.random.PRNGKey(0)
    k_h, k_n = jax.random.split(key)
    H = jax.random.normal(k_h, (B, T, NB), dtype=jnp.float32)
    # TODO(synk): torch.rand's exact RNG stream is not reproducible in JAX; noise is
    # drawn from the same Uniform[-1, 1) distribution with jax.random instead.
    noise = jax.random.uniform(k_n, (B, T, Fr), dtype=jnp.float32) * 2.0 - 1.0

    out = filtered_noise_generator(H, noise)
    out = jax.block_until_ready(out)
    assert out.shape == (B, T * Fr) and out.dtype == jnp.float32

    ref = _reference(H, noise)
    np.testing.assert_allclose(np.asarray(out), ref, rtol=2e-3, atol=2e-3)
    print("KERNEL_OK")
</pallas_src>

<mosaic_0001>
module attributes {stable_mosaic.version = 11 : i64} {
  func.func @_filtered_noise_kernel(%arg0: i32, %arg1: memref<12x13xf32, #tpu.memory_space<vmem>>, %arg2: memref<12x8xf32, #tpu.memory_space<vmem>>, %arg3: memref<12x5xf32, #tpu.memory_space<vmem>>, %arg4: memref<13x128xf32, #tpu.memory_space<vmem>>, %arg5: memref<12x8xf32, #tpu.memory_space<vmem>>, %arg6: memref<12x128xf32, #tpu.memory_space<vmem>>) attributes {dimension_semantics = [#tpu.dimension_semantics<parallel>], iteration_bounds = array<i64: 1>, scalar_prefetch = 0 : i64, scratch_operands = 1 : i64, tpu.core_type = #tpu.core_type<tc>, window_params = [{transform_indices = @transform_0, window_bounds = array<i64: 12, 13>}, {transform_indices = @transform_1, window_bounds = array<i64: 12, 8>}, {transform_indices = @transform_2, window_bounds = array<i64: 12, 5>}, {pipeline_mode = #tpu.pipeline_mode<synchronous>, transform_indices = @transform_3, window_bounds = array<i64: 13, 128>}, {transform_indices = @transform_4, window_bounds = array<i64: 12, 8>}]} {
    %c0 = arith.constant 0 : index
    %c0_0 = arith.constant 0 : index
    %0 = vector.load %arg1[%c0, %c0_0] : memref<12x13xf32, #tpu.memory_space<vmem>>, vector<12x13xf32>
    %c0_1 = arith.constant 0 : index
    %c0_2 = arith.constant 0 : index
    %1 = vector.load %arg4[%c0_1, %c0_2] : memref<13x128xf32, #tpu.memory_space<vmem>>, vector<13x128xf32>
    %cst = arith.constant dense<0.000000e+00> : vector<12x128xf32>
    %2 = tpu.matmul %0, %1, %cst {dimension_numbers = #tpu.dot_dimension_numbers<[1], [0], [0], [1], [0, 0, 1, 1], [], []>} : vector<12x13xf32>, vector<13x128xf32>, vector<12x128xf32> -> vector<12x128xf32>
    %c0_3 = arith.constant 0 : index
    %c0_4 = arith.constant 0 : index
    %3 = vector.load %arg6[%c0_3, %c0_4] : memref<12x128xf32, #tpu.memory_space<vmem>>, vector<12x128xf32>
    tpu.vector_store %arg6[%c0_3, %c0_4], %2 {strides = array<i32>} : memref<12x128xf32, #tpu.memory_space<vmem>>, vector<12x128xf32>,
    %c0_5 = arith.constant 0 : index
    %c0_6 = arith.constant 0 : index
    %4 = vector.load %arg6[%c0_5, %c0_6] : memref<12x128xf32, #tpu.memory_space<vmem>>, vector<12x128xf32>
    %c0_7 = arith.constant 0 : index
    %c0_8 = arith.constant 0 : index
    %5 = vector.load %arg2[%c0_7, %c0_8] : memref<12x8xf32, #tpu.memory_space<vmem>>, vector<12x8xf32>
    %6 = vector.extract_strided_slice %5 {offsets = [0, 0], sizes = [12, 1], strides = [1, 1]} : vector<12x8xf32> to vector<12x1xf32>
    %7 = vector.broadcast %6 : vector<12x1xf32> to vector<12x128xf32>
    %8 = arith.mulf %7, %4 : vector<12x128xf32>
    %9 = vector.extract_strided_slice %5 {offsets = [0, 1], sizes = [12, 1], strides = [1, 1]} : vector<12x8xf32> to vector<12x1xf32>
    %10 = vector.extract_strided_slice %4 {offsets = [0, 127], sizes = [12, 1], strides = [1, 1]} : vector<12x128xf32> to vector<12x1xf32>
    %11 = vector.extract_strided_slice %4 {offsets = [0, 0], sizes = [12, 127], strides = [1, 1]} : vector<12x128xf32> to vector<12x127xf32>
    %12 = tpu.concatenate %10, %11 in 1 : vector<12x1xf32>, vector<12x127xf32> -> vector<12x128xf32>
    %13 = vector.broadcast %9 : vector<12x1xf32> to vector<12x128xf32>
    %14 = arith.mulf %13, %12 : vector<12x128xf32>
    %15 = arith.addf %8, %14 : vector<12x128xf32>
    %16 = vector.extract_strided_slice %5 {offsets = [0, 2], sizes = [12, 1], strides = [1, 1]} : vector<12x8xf32> to vector<12x1xf32>
    %17 = vector.extract_strided_slice %4 {offsets = [0, 126], sizes = [12, 2], strides = [1, 1]} : vector<12x128xf32> to vector<12x2xf32>
    %18 = vector.extract_strided_slice %4 {offsets = [0, 0], sizes = [12, 126], strides = [1, 1]} : vector<12x128xf32> to vector<12x126xf32>
    %19 = tpu.concatenate %17, %18 in 1 : vector<12x2xf32>, vector<12x126xf32> -> vector<12x128xf32>
    %20 = vector.broadcast %16 : vector<12x1xf32> to vector<12x128xf32>
    %21 = arith.mulf %20, %19 : vector<12x128xf32>
    %22 = arith.addf %15, %21 : vector<12x128xf32>
    %23 = vector.extract_strided_slice %5 {offsets = [0, 3], sizes = [12, 1], strides = [1, 1]} : vector<12x8xf32> to vector<12x1xf32>
    %24 = vector.extract_strided_slice %4 {offsets = [0, 125], sizes = [12, 3], strides = [1, 1]} : vector<12x128xf32> to vector<12x3xf32>
    %25 = vector.extract_strided_slice %4 {offsets = [0, 0], sizes = [12, 125], strides = [1, 1]} : vector<12x128xf32> to vector<12x125xf32>
    %26 = tpu.concatenate %24, %25 in 1 : vector<12x3xf32>, vector<12x125xf32> -> vector<12x128xf32>
    %27 = vector.broadcast %23 : vector<12x1xf32> to vector<12x128xf32>
    %28 = arith.mulf %27, %26 : vector<12x128xf32>
    %29 = arith.addf %22, %28 : vector<12x128xf32>
    %30 = vector.extract_strided_slice %5 {offsets = [0, 4], sizes = [12, 1], strides = [1, 1]} : vector<12x8xf32> to vector<12x1xf32>
    %31 = vector.extract_strided_slice %4 {offsets = [0, 124], sizes = [12, 4], strides = [1, 1]} : vector<12x128xf32> to vector<12x4xf32>
    %32 = vector.extract_strided_slice %4 {offsets = [0, 0], sizes = [12, 124], strides = [1, 1]} : vector<12x128xf32> to vector<12x124xf32>
    %33 = tpu.concatenate %31, %32 in 1 : vector<12x4xf32>, vector<12x124xf32> -> vector<12x128xf32>
    %34 = vector.broadcast %30 : vector<12x1xf32> to vector<12x128xf32>
    %35 = arith.mulf %34, %33 : vector<12x128xf32>
    %36 = arith.addf %29, %35 : vector<12x128xf32>
    %37 = vector.extract_strided_slice %5 {offsets = [0, 5], sizes = [12, 1], strides = [1, 1]} : vector<12x8xf32> to vector<12x1xf32>
    %38 = vector.extract_strided_slice %4 {offsets = [0, 123], sizes = [12, 5], strides = [1, 1]} : vector<12x128xf32> to vector<12x5xf32>
    %39 = vector.extract_strided_slice %4 {offsets = [0, 0], sizes = [12, 123], strides = [1, 1]} : vector<12x128xf32> to vector<12x123xf32>
    %40 = tpu.concatenate %38, %39 in 1 : vector<12x5xf32>, vector<12x123xf32> -> vector<12x128xf32>
    %41 = vector.broadcast %37 : vector<12x1xf32> to vector<12x128xf32>
    %42 = arith.mulf %41, %40 : vector<12x128xf32>
    %43 = arith.addf %36, %42 : vector<12x128xf32>
    %44 = vector.extract_strided_slice %5 {offsets = [0, 6], sizes = [12, 1], strides = [1, 1]} : vector<12x8xf32> to vector<12x1xf32>
    %45 = vector.extract_strided_slice %4 {offsets = [0, 122], sizes = [12, 6], strides = [1, 1]} : vector<12x128xf32> to vector<12x6xf32>
    %46 = vector.extract_strided_slice %4 {offsets = [0, 0], sizes = [12, 122], strides = [1, 1]} : vector<12x128xf32> to vector<12x122xf32>
    %47 = tpu.concatenate %45, %46 in 1 : vector<12x6xf32>, vector<12x122xf32> -> vector<12x128xf32>
    %48 = vector.broadcast %44 : vector<12x1xf32> to vector<12x128xf32>
    %49 = arith.mulf %48, %47 : vector<12x128xf32>
    %50 = arith.addf %43, %49 : vector<12x128xf32>
    %51 = vector.extract_strided_slice %5 {offsets = [0, 7], sizes = [12, 1], strides = [1, 1]} : vector<12x8xf32> to vector<12x1xf32>
    %52 = vector.extract_strided_slice %4 {offsets = [0, 121], sizes = [12, 7], strides = [1, 1]} : vector<12x128xf32> to vector<12x7xf32>
    %53 = vector.extract_strided_slice %4 {offsets = [0, 0], sizes = [12, 121], strides = [1, 1]} : vector<12x128xf32> to vector<12x121xf32>
    %54 = tpu.concatenate %52, %53 in 1 : vector<12x7xf32>, vector<12x121xf32> -> vector<12x128xf32>
    %55 = vector.broadcast %51 : vector<12x1xf32> to vector<12x128xf32>
    %56 = arith.mulf %55, %54 : vector<12x128xf32>
    %57 = arith.addf %50, %56 : vector<12x128xf32>
    %c0_9 = arith.constant 0 : index
    %c0_10 = arith.constant 0 : index
    %58 = vector.load %arg6[%c0_9, %c0_10] : memref<12x128xf32, #tpu.memory_space<vmem>>, vector<12x128xf32>
    tpu.vector_store %arg6[%c0_9, %c0_10], %57 {strides = array<i32>} : memref<12x128xf32, #tpu.memory_space<vmem>>, vector<12x128xf32>,
    %c0_11 = arith.constant 0 : index
    %c16 = arith.constant 16 : index
    %59 = vector.load %arg6[%c0_11, %c16] : memref<12x128xf32, #tpu.memory_space<vmem>>, vector<12x8xf32>
    %c0_12 = arith.constant 0 : index
    %c0_13 = arith.constant 0 : index
    %60 = vector.load %arg6[%c0_12, %c0_13] : memref<12x128xf32, #tpu.memory_space<vmem>>, vector<12x8xf32>
    %c0_14 = arith.constant 0 : index
    %c0_15 = arith.constant 0 : index
    %61 = vector.load %arg3[%c0_14, %c0_15] : memref<12x5xf32, #tpu.memory_space<vmem>>, vector<12x1xf32>
    %62 = vector.extract_strided_slice %60 {offsets = [2, 0], sizes = [10, 8], strides = [1, 1]} : vector<12x8xf32> to vector<10x8xf32>
    %63 = vector.extract_strided_slice %60 {offsets = [0, 0], sizes = [2, 8], strides = [1, 1]} : vector<12x8xf32> to vector<2x8xf32>
    %64 = tpu.concatenate %62, %63 in 0 : vector<10x8xf32>, vector<2x8xf32> -> vector<12x8xf32>
    %65 = vector.broadcast %61 : vector<12x1xf32> to vector<12x8xf32>
    %66 = arith.mulf %65, %64 : vector<12x8xf32>
    %67 = arith.addf %59, %66 : vector<12x8xf32>
    %c0_16 = arith.constant 0 : index
    %c8 = arith.constant 8 : index
    %68 = vector.load %arg6[%c0_16, %c8] : memref<12x128xf32, #tpu.memory_space<vmem>>, vector<12x8xf32>
    %c0_17 = arith.constant 0 : index
    %c1 = arith.constant 1 : index
    %69 = vector.load %arg3[%c0_17, %c1] : memref<12x5xf32, #tpu.memory_space<vmem>>, vector<12x1xf32>
    %70 = vector.extract_strided_slice %68 {offsets = [1, 0], sizes = [11, 8], strides = [1, 1]} : vector<12x8xf32> to vector<11x8xf32>
    %71 = vector.extract_strided_slice %68 {offsets = [0, 0], sizes = [1, 8], strides = [1, 1]} : vector<12x8xf32> to vector<1x8xf32>
    %72 = tpu.concatenate %70, %71 in 0 : vector<11x8xf32>, vector<1x8xf32> -> vector<12x8xf32>
    %73 = vector.broadcast %69 : vector<12x1xf32> to vector<12x8xf32>
    %74 = arith.mulf %73, %72 : vector<12x8xf32>
    %75 = arith.addf %67, %74 : vector<12x8xf32>
    %c0_18 = arith.constant 0 : index
    %c24 = arith.constant 24 : index
    %76 = vector.load %arg6[%c0_18, %c24] : memref<12x128xf32, #tpu.memory_space<vmem>>, vector<12x8xf32>
    %c0_19 = arith.constant 0 : index
    %c3 = arith.constant 3 : index
    %77 = vector.load %arg3[%c0_19, %c3] : memref<12x5xf32, #tpu.memory_space<vmem>>, vector<12x1xf32>
    %78 = vector.extract_strided_slice %76 {offsets = [11, 0], sizes = [1, 8], strides = [1, 1]} : vector<12x8xf32> to vector<1x8xf32>
    %79 = vector.extract_strided_slice %76 {offsets = [0, 0], sizes = [11, 8], strides = [1, 1]} : vector<12x8xf32> to vector<11x8xf32>
    %80 = tpu.concatenate %78, %79 in 0 : vector<1x8xf32>, vector<11x8xf32> -> vector<12x8xf32>
    %81 = vector.broadcast %77 : vector<12x1xf32> to vector<12x8xf32>
    %82 = arith.mulf %81, %80 : vector<12x8xf32>
    %83 = arith.addf %75, %82 : vector<12x8xf32>
    %c0_20 = arith.constant 0 : index
    %c32 = arith.constant 32 : index
    %84 = vector.load %arg6[%c0_20, %c32] : memref<12x128xf32, #tpu.memory_space<vmem>>, vector<12x8xf32>
    %c0_21 = arith.constant 0 : index
    %c4 = arith.constant 4 : index
    %85 = vector.load %arg3[%c0_21, %c4] : memref<12x5xf32, #tpu.memory_space<vmem>>, vector<12x1xf32>
    %86 = vector.extract_strided_slice %84 {offsets = [10, 0], sizes = [2, 8], strides = [1, 1]} : vector<12x8xf32> to vector<2x8xf32>
    %87 = vector.extract_strided_slice %84 {offsets = [0, 0], sizes = [10, 8], strides = [1, 1]} : vector<12x8xf32> to vector<10x8xf32>
    %88 = tpu.concatenate %86, %87 in 0 : vector<2x8xf32>, vector<10x8xf32> -> vector<12x8xf32>
    %89 = vector.broadcast %85 : vector<12x1xf32> to vector<12x8xf32>
    %90 = arith.mulf %89, %88 : vector<12x8xf32>
    %91 = arith.addf %83, %90 : vector<12x8xf32>
    %c0_22 = arith.constant 0 : index
    %c0_23 = arith.constant 0 : index
    %92 = vector.load %arg5[%c0_22, %c0_23] : memref<12x8xf32, #tpu.memory_space<vmem>>, vector<12x8xf32>
    tpu.vector_store %arg5[%c0_22, %c0_23], %91 {strides = array<i32>} : memref<12x8xf32, #tpu.memory_space<vmem>>, vector<12x8xf32>,
    return
  }
  func.func @transform_0(%arg0: i32) -> (i32, i32) {
    %c0_i32 = arith.constant 0 : i32
    %c0_i32_0 = arith.constant 0 : i32
    return %arg0, %c0_i32 : i32, i32
  }
  func.func @transform_1(%arg0: i32) -> (i32, i32) {
    %c0_i32 = arith.constant 0 : i32
    %c0_i32_0 = arith.constant 0 : i32
    return %arg0, %c0_i32 : i32, i32
  }
  func.func @transform_2(%arg0: i32) -> (i32, i32) {
    %c0_i32 = arith.constant 0 : i32
    %c0_i32_0 = arith.constant 0 : i32
    return %arg0, %c0_i32 : i32, i32
  }
  func.func @transform_3(%arg0: i32) -> (i32, i32) {
    %c0_i32 = arith.constant 0 : i32
    %c0_i32_0 = arith.constant 0 : i32
    %c0_i32_1 = arith.constant 0 : i32
    return %c0_i32, %c0_i32_0 : i32, i32
  }
  func.func @transform_4(%arg0: i32) -> (i32, i32) {
    %c0_i32 = arith.constant 0 : i32
    %c0_i32_0 = arith.constant 0 : i32
    return %arg0, %c0_i32 : i32, i32
  }
}

</mosaic_0001>

<bundles_post_ra>
// kernel: tpu_custom_call.1
= control target key start
LH: loop header
LB: loop body
LE: loop exit
PB: predicated region body
PF: predicated region fallthrough
CT: control target
= control target key end

     0   :  { %vm28_vm0 = vcmask 1044480   ;;  %vm21_vm1 = vcmask 105472   ;;  %v444_v3 = vmov 2   ;;  %v445_v6 = vmov 1   ;;  %s454_s26 = smov 4   ;;  %s455_s27 = smov 3   ;;  %s542_s3 = inlined_call_operand.vmem [shape: f32[13,128], index: 3, kind: input, shape index: {}]   ;;  %s543_s0 = inlined_call_operand.vmem [shape: f32[12,13], index: 0, kind: input, shape index: {}]   ;;  %s544_s1 = inlined_call_operand.vmem [shape: f32[12,8], index: 1, kind: input, shape index: {}]   ;;  %s545_s2 = inlined_call_operand.vmem [shape: f32[12,5], index: 2, kind: input, shape index: {}]   ;;  %s546_s4 = inlined_call_operand.vmem [shape: f32[12,8], index: 4, kind: output, shape index: {}]  }
   0x1   :  { %v20_v0 = vld [vmem:[%s542_s3 + $0x8] sm:$0x1f]  ;;  %v19_v1 = vld [vmem:[%s542_s3] sm:$0xff]  ;;  %425 = vset.pattern.permute.xlu0 %v444_v3  ;;  %424 = vset.pattern.permute.xlu1 %v445_v6  ;;  %v446_v8 = vmov 3   ;;  %v447_v9 = vmov 4   ;;  %v448_v10 = vmov 5  }
   0x2   :  { %v17_v2 = vld [vmem:[%s543_s0] sm:$0xff]  ;;  %398 = vmatprep.subr.msk.mxu0 %vm28_vm0, %v20_v0  ;;  %v18_v5 = vld [vmem:[%s543_s0 + $0x8] sm:$0xf]  ;;  %v449_v11 = vmov 6   ;;  %v450_v12 = vmov 7   ;;  %v451_v13 = vmov 0  }
   0x3   :  { %402 = vmatprep.mubr.msk.f32.mxu0 %vm21_vm1, %v17_v2  ;;  %v111_v4 = vld [vmem:[%s544_s1] sm:$0xff]  ;;  %399 = vmatpush3.msk.msra.mxu0 %vm28_vm0, %v20_v0  ;;  %v112_v7 = vld [vmem:[%s544_s1 + $0x8] sm:$0xf]  ;;  %s452_s0 = smov 2   ;;  %s453_s1 = smov 1   ;;  %vm261_vm2 = vcmask 1045504  }
   0x4   :  { %152 = vperm.xlu0 %425, %v111_v4   ;;  %400 = vmatprep.subr.mxu0 %v19_v1  ;;  %s456_s28 = smov 5   ;;  %s457_s29 = smov 6   ;;  %v257_v17 = vld [vmem:[%s545_s2] sm:$0xff]  ;;  %v258_v18 = vld [vmem:[%s545_s2 + $0x8] sm:$0xf]  ;;  %vm269_vm3 = vcmask 1041408  }
   0x5   :  { %401 = vmatpush3.msra.mxu0 %v19_v1  ;;  %134 = vperm.xlu1 %424, %v111_v4   ;;  %s458_s30 = smov 7   ;;  %vm301_vm4 = vcmask 1042432   ;;  %s459_s2 = smov 16   ;;  %vm293_vm5 = vcmask 1046528   ;;  %vm325_vm6 = vcmask 1040384   ;;  %vm383_vm7 = vcmask 64512  }
   0x6   :  { %403 = vmatmul.mubr.msk.f32.vlgmr.msra.gmra.mxu0 %vm21_vm1, %v18_v5  ;;  %s460_s9 = smov 8   ;;  %s461_s10 = smov 120   ;;  %vm385_vm8 = vcmask 60416  }
   0x7   :  { %s462_s11 = smov 112  }
   0x8   :  { %428 = vset.pattern.permute.xlu0 %v446_v8 }
   0x9   :  { %174 = vperm.xlu0 %428, %v112_v7   ;;  %138 = vperm.xlu1 %424, %v112_v7  }
   0xd   :  { %429 = vset.pattern.permute.xlu0 %v447_v9  ;;  %426 = vset.pattern.permute.xlu1 %v444_v3 }
   0xe   :  { %188 = vperm.xlu0 %429, %v111_v4   ;;  %156 = vperm.xlu1 %426, %v112_v7  }
  0x12   :  { %432 = vset.pattern.permute.xlu0 %v448_v10  ;;  %427 = vset.pattern.permute.xlu1 %v446_v8 }
  0x13   :  { %210 = vperm.xlu0 %432, %v112_v7   ;;  %170 = vperm.xlu1 %427, %v111_v4  }
  0x17   :  { %433 = vset.pattern.permute.xlu0 %v449_v11  ;;  %430 = vset.pattern.permute.xlu1 %v447_v9 }
  0x18   :  { %224 = vperm.xlu0 %433, %v111_v4   ;;  %192 = vperm.xlu1 %430, %v112_v7  }
  0x1c   :  { %436 = vset.pattern.permute.xlu0 %v450_v12  ;;  %431 = vset.pattern.permute.xlu1 %v448_v10 }
  0x1d   :  { %246 = vperm.xlu0 %436, %v112_v7   ;;  %206 = vperm.xlu1 %431, %v111_v4  }
  0x21   :  { %437 = vset.pattern.permute.xlu0 %v451_v13  ;;  %434 = vset.pattern.permute.xlu1 %v449_v11 }
  0x22   :  { %115 = vperm.xlu0 %437, %v111_v4   ;;  %228 = vperm.xlu1 %434, %v112_v7  }
  0x26   :  { %120 = vperm.xlu0 %437, %v112_v7   ;;  %435 = vset.pattern.permute.xlu1 %v450_v12 }
  0x27   :  { %242 = vperm.xlu1 %435, %v111_v4  }
  0x2b   :  { %438 = vset.pattern.permute.xlu1 %v451_v13 }
  0x7f   :  { %v153_v20 = vpop.permute.xlu0 %152 }
  0x80   :  { %v135_v19 = vpop.permute.xlu1 %134 }
  0x84   :  { %v139_v21 = vpop.permute.xlu1 %138  ;;  %v175_v22 = vpop.permute.xlu0 %174 }
  0x89   :  { %v157_v23 = vpop.permute.xlu1 %156  ;;  %v189_v24 = vpop.permute.xlu0 %188 }
  0x8e   :  { %v171_v25 = vpop.permute.xlu1 %170  ;;  %v211_v26 = vpop.permute.xlu0 %210 }
  0x93   :  { %v193_v27 = vpop.permute.xlu1 %192  ;;  %v225_v28 = vpop.permute.xlu0 %224 }
  0x98   :  { %v207_v29 = vpop.permute.xlu1 %206  ;;  %v247_v30 = vpop.permute.xlu0 %246 }
  0x9d   :  { %v229_v31 = vpop.permute.xlu1 %228  ;;  %v116_v32 = vpop.permute.xlu0 %115 }
  0xa1   :  { %v121_v34 = vpop.permute.xlu0 %120 }
  0xa2   :  { %v243_v33 = vpop.permute.xlu1 %242 }
  0xc6   :  { %v404_v14 = vpop.f32.mrf.mxu0 }
  0xc7   :  { %108 = vst [vmem:[#allocation2 + $0x8] sm:$0xf] %v404_v14 }
  0xc8   :  { %v513_v16 = vpop.f32.mrf.mxu0 }
  0xc9   :  { %v123_v61 = vmul.f32 %v116_v32, %v513_v16 }
  0xce   :  { %v110_v15 = vld [vmem:[#allocation2 + $0x8] sm:$0xf] }
  0xcf   :  { %147 = vrot.lane.b32.xlu0 %v110_v15, %s452_s0  ;;  %129 = vrot.lane.b32.xlu1 %v110_v15, %s453_s1  ;;  %v124_v37 = vmul.f32 %v121_v34, %v110_v15 }
  0xd3   :  { %183 = vrot.lane.b32.xlu0 %v110_v15, %s454_s26  ;;  %165 = vrot.lane.b32.xlu1 %v110_v15, %s455_s27 }
  0xd7   :  { %201 = vrot.lane.b32.xlu1 %v110_v15, %s456_s28  ;;  %217 = vrot.lane.b32.xlu0 %v513_v16, %s457_s29 }
  0xdb   :  { %219 = vrot.lane.b32.xlu1 %v110_v15, %s457_s29  ;;  %235 = vrot.lane.b32.xlu0 %v513_v16, %s458_s30 }
  0xdf   :  { %237 = vrot.lane.b32.xlu1 %v110_v15, %s458_s30  ;;  %273 = vperm.xlu0 %437, %v257_v17  }
  0xe3   :  { %127 = vrot.lane.b32.xlu1 %v513_v16, %s453_s1  ;;  %440 = vset.pattern.permute.xlu0 %v445_v6 }
  0xe4   :  { %308 = vperm.xlu0 %440, %v258_v18  }
  0xe7   :  { %145 = vrot.lane.b32.xlu1 %v513_v16, %s452_s0 }
  0xe8   :  { %442 = vset.pattern.permute.xlu0 %v447_v9 }
  0xe9   :  { %356 = vperm.xlu0 %442, %v257_v17  }
  0xeb   :  { %163 = vrot.lane.b32.xlu1 %v513_v16, %s455_s27 }
  0xef   :  { %181 = vrot.lane.b32.xlu1 %v513_v16, %s454_s26 }
  0xf3   :  { %199 = vrot.lane.b32.xlu1 %v513_v16, %s456_s28 }
  0xf7   :  { %278 = vperm.xlu1 %438, %v258_v18  }
  0xfb   :  { %439 = vset.pattern.permute.xlu1 %v445_v6 }
  0xfc   :  { %304 = vperm.xlu1 %439, %v257_v17  }
 0x100   :  { %441 = vset.pattern.permute.xlu1 %v446_v8 }
 0x101   :  { %333 = vperm.xlu1 %441, %v257_v17  }
 0x105   :  { %337 = vperm.xlu1 %441, %v258_v18  }
 0x109   :  { %443 = vset.pattern.permute.xlu1 %v447_v9 }
 0x10a   :  { %360 = vperm.xlu1 %443, %v258_v18  }
 0x141   :  { %v148_v35 = vpop.permute.xlu0 %147  ;;  %v130_v36 = vpop.permute.xlu1 %129 }
 0x142   :  { %v142_v38 = vmul.f32 %v139_v21, %v130_v36  ;;  %v160_v39 = vmul.f32 %v157_v23, %v148_v35 }
 0x144   :  { %v144_v40 = vadd.f32 %v142_v38, %v124_v37 }
 0x145   :  { %v166_v41 = vpop.permute.xlu1 %165  ;;  %v184_v44 = vpop.permute.xlu0 %183 }
 0x146   :  { %v162_v42 = vadd.f32 %v160_v39, %v144_v40  ;;  %v178_v43 = vmul.f32 %v175_v22, %v166_v41  ;;  %v196_v47 = vmul.f32 %v193_v27, %v184_v44 }
 0x148   :  { %v180_v45 = vadd.f32 %v178_v43, %v162_v42 }
 0x149   :  { %v202_v46 = vpop.permute.xlu1 %201  ;;  %v218_v1 = vpop.permute.xlu0 %217 }
 0x14a   :  { %v198_v48 = vadd.f32 %v196_v47, %v180_v45  ;;  %v214_v49 = vmul.f32 %v211_v26, %v202_v46  ;;  %v231_v10 = vmul.f32 %v225_v28, %v218_v1 }
 0x14c   :  { %v216_v52 = vadd.f32 %v214_v49, %v198_v48 }
 0x14d   :  { %v220_v50 = vpop.permute.xlu1 %219  ;;  %v236_v9 = vpop.permute.xlu0 %235 }
 0x14e   :  { %v232_v51 = vmul.f32 %v229_v31, %v220_v50  ;;  %v249_v12 = vmul.f32 %v243_v33, %v236_v9 }
 0x150   :  { %v234_v54 = vadd.f32 %v232_v51, %v216_v52 }
 0x151   :  { %v238_v53 = vpop.permute.xlu1 %237 }
 0x152   :  { %v250_v55 = vmul.f32 %v247_v30, %v238_v53 }
 0x154   :  { %v252_v56 = vadd.f32 %v250_v55, %v234_v54 }
 0x155   :  { %v128_v57 = vpop.permute.xlu1 %127 }
 0x156   :  { %254 = vst [vmem:[#allocation2 + $0x8] sm:$0xf] %v252_v56  ;;  %v141_v59 = vmul.f32 %v135_v19, %v128_v57 }
 0x158   :  { %v143_v63 = vadd.f32 %v141_v59, %v123_v61 }
 0x159   :  { %v146_v58 = vpop.permute.xlu1 %145 }
 0x15a   :  { %v159_v62 = vmul.f32 %v153_v20, %v146_v58  ;;  %v274_v19 = vpop.permute.xlu0 %273 }
 0x15c   :  { %v161_v3 = vadd.f32 %v159_v62, %v143_v63 }
 0x15d   :  { %v164_v60 = vpop.permute.xlu1 %163  ;;  %v256_v14 = vld [vmem:[#allocation2 + $0x8] sm:$0xf] }
 0x15e   :  { %v177_v0 = vmul.f32 %v171_v25, %v164_v60  ;;  %v263_v16 = vrot.slane %v256_v14, 2  ;;  %v295_v25 = vrot.slane %v256_v14, 1  ;;  %v323_v35 = vrot.slane %v256_v14, 3 }
 0x15f   :  { %v327_v40 = vrot.slane %v256_v14, 7  ;;  %v352_v45 = vrot.slane %v256_v14, 6 }
 0x160   :  { %v179_v5 = vadd.f32 %v177_v0, %v161_v3 }
 0x161   :  { %v182_v2 = vpop.permute.xlu1 %181 }
 0x162   :  { %v195_v4 = vmul.f32 %v189_v24, %v182_v2 }
 0x164   :  { %v197_v7 = vadd.f32 %v195_v4, %v179_v5 }
 0x165   :  { %v200_v6 = vpop.permute.xlu1 %199 }
 0x166   :  { %v213_v8 = vmul.f32 %v207_v29, %v200_v6  ;;  %v309_v29 = vpop.permute.xlu0 %308 }
 0x168   :  { %v215_v11 = vadd.f32 %v213_v8, %v197_v7 }
 0x16a   :  { %v233_v13 = vadd.f32 %v231_v10, %v215_v11  ;;  %v357_v39 = vpop.permute.xlu0 %356 }
 0x16c   :  { %v251_v15 = vadd.f32 %v249_v12, %v233_v13 }
 0x16e   :  { %v267_v17 = vrot.slane %v251_v15, 6  ;;  %v262_v18 = vrot.slane %v251_v15, 2  ;;  %v299_v20 = vrot.slane %v251_v15, 5  ;;  %v294_v27 = vrot.slane %v251_v15, 1 }
 0x16f   :  { %v326_v34 = vrot.slane %v251_v15, 7 }
 0x170   :  { %v264_v21 = vsel %vm261_vm2, %v262_v18, %v263_v16  ;;  %v270_v24 = vsel %vm269_vm3, %v263_v16, %v267_v17  ;;  %v302_v28 = vsel %vm301_vm4, %v295_v25, %v299_v20  ;;  %v296_v32 = vsel %vm293_vm5, %v294_v27, %v295_v25 }
 0x171   :  { %v281_v22 = vmul.f32 %v274_v19, %v264_v21  ;;  %v312_v30 = vmul.f32 %v309_v29, %v302_v28  ;;  %v331_v37 = vsel %vm325_vm6, %v323_v35, %v326_v34  ;;  %v328_v42 = vsel %vm325_vm6, %v326_v34, %v327_v40 }
 0x172   :  { %v279_v23 = vpop.permute.xlu1 %278  ;;  %v363_v43 = vmul.f32 %v357_v39, %v270_v24  ;;  %v353_v47 = vsel %vm269_vm3, %v267_v17, %v352_v45 }
 0x173   :  { %v282_v26 = vmul.f32 %v279_v23, %v270_v24  ;;  %285 = vrot.lane.b32.xlu1 %v281_v22, %s459_s2 }
 0x175   :  { %287 = vrot.lane.b32.xlu0 %v282_v26, %s459_s2 }
 0x177   :  { %v305_v31 = vpop.permute.xlu1 %304 }
 0x178   :  { %v311_v33 = vmul.f32 %v305_v31, %v296_v32 }
 0x179   :  { %317 = vrot.lane.b32.xlu0 %v312_v30, %s460_s9 }
 0x17a   :  { %315 = vrot.lane.b32.xlu1 %v311_v33, %s460_s9 }
 0x17c   :  { %v334_v36 = vpop.permute.xlu1 %333 }
 0x17d   :  { %v340_v38 = vmul.f32 %v334_v36, %v331_v37 }
 0x17f   :  { %344 = vrot.lane.b32.xlu1 %v340_v38, %s461_s10 }
 0x180   :  { %v338_v41 = vpop.permute.xlu1 %337 }
 0x181   :  { %v341_v44 = vmul.f32 %v338_v41, %v328_v42 }
 0x183   :  { %346 = vrot.lane.b32.xlu0 %v341_v44, %s461_s10  ;;  %367 = vrot.lane.b32.xlu1 %v363_v43, %s462_s11 }
 0x185   :  { %v361_v46 = vpop.permute.xlu1 %360 }
 0x186   :  { %v364_v48 = vmul.f32 %v361_v46, %v353_v47 }
 0x188   :  { %369 = vrot.lane.b32.xlu0 %v364_v48, %s462_s11 }
 0x1e5   :  { %v286_v49 = vpop.permute.xlu1 %285 }
 0x1e6   :  { %v291_v52 = vadd.f32 %v286_v49, %v251_v15 }
 0x1e7   :  { %v288_v50 = vpop.permute.xlu0 %287 }
 0x1e8   :  { %v292_v57 = vadd.f32 %v288_v50, %v256_v14 }
 0x1eb   :  { %v318_v53 = vpop.permute.xlu0 %317 }
 0x1ec   :  { %v316_v51 = vpop.permute.xlu1 %315  ;;  %v322_v61 = vadd.f32 %v318_v53, %v292_v57 }
 0x1ed   :  { %v321_v55 = vadd.f32 %v316_v51, %v291_v52 }
 0x1f1   :  { %v345_v54 = vpop.permute.xlu1 %344 }
 0x1f2   :  { %v350_v56 = vadd.f32 %v345_v54, %v321_v55 }
 0x1f5   :  { %v347_v58 = vpop.permute.xlu0 %346  ;;  %v368_v59 = vpop.permute.xlu1 %367 }
 0x1f6   :  { %v373_v60 = vadd.f32 %v368_v59, %v350_v56  ;;  %v351_v62 = vadd.f32 %v347_v58, %v322_v61 }
 0x1f8   :  { %377 = vrot.lane.b32.xlu1 %v373_v60, %s462_s11 }
 0x1fa   :  { %v370_v63 = vpop.permute.xlu0 %369 }
 0x1fb   :  { %v374_v0 = vadd.f32 %v370_v63, %v351_v62 }
 0x1fd   :  { %379 = vrot.lane.b32.xlu0 %v374_v0, %s462_s11 }
 0x26a   :  { %v378_v1 = vpop.permute.xlu1 %377 }
 0x26b   :  { %384 = vst.msk [vmem:[%s546_s4] sm:$0xff] %vm383_vm7, %v378_v1 }
 0x26f   :  { %v380_v2 = vpop.permute.xlu0 %379 }
 0x270   :  { %386 = vst.msk [vmem:[%s546_s4 + $0x8] sm:$0xf] %vm385_vm8, %v380_v2 }

</bundles_post_ra>
